<compile_context>
chip_gen: v7x
topology: tpu7x:2x2x1
jax: 0.10.0
libtpu: 0.0.40
codegen_flags: <defaults>
</compile_context>

<pallas_src>
import functools

import jax
import jax.numpy as jnp
from jax.experimental import pallas as pl
from jax.experimental.pallas import tpu as pltpu


def _lowest(dtype):
    """Identity element of max for this dtype."""
    dtype = jnp.dtype(dtype)
    if jnp.issubdtype(dtype, jnp.floating):
        return float("-inf")
    return int(jnp.iinfo(dtype).min)


def _round_up(x, m):
    return (x + m - 1) // m * m


def _max_agg_kernel(m_ref, o_ref, acc_ref, *, n_rows, tile_n, chunk_rows, sub,
                    grid_n, mask_possible, fill):
    s = pl.program_id(0)   # row-half split ("parallel" -> v7x megacore)
    n = pl.program_id(1)   # reduction sweep within the split ("arbitrary")

    @pl.when(n == 0)
    def _init():
        acc_ref[...] = jnp.full(acc_ref.shape, fill, acc_ref.dtype)

    feat = acc_ref.shape[-1]
    groups = chunk_rows // sub
    n_chunks = tile_n // chunk_rows
    row_start = (s * grid_n + n) * tile_n   # first logical row of this block

    def read_chunk(c):
        start = pl.multiple_of(c * chunk_rows, sub)
        return m_ref[pl.ds(start, chunk_rows), :]           # (chunk_rows, F)

    def accumulate(chunk):
        # Elementwise (VPU) maxima across sublane groups; no cross-sublane
        # work and no narrow store in the hot loop.
        if groups > 1:
            part = jnp.max(chunk.reshape(groups, sub, feat), axis=0)
        else:
            part = chunk
        acc_ref[...] = jnp.maximum(acc_ref[...], part)

    def run(masked):
        @pl.loop(0, n_chunks)
        def _(c):
            chunk = read_chunk(c)
            if masked:
                # Rows past the true N carry garbage; neutralize them with the
                # identity of max.  Only the final partial block pays this.
                rows = jax.lax.broadcasted_iota(jnp.int32, chunk.shape, 0)
                rows = rows + (row_start + c * chunk_rows)
                chunk = jnp.where(rows < n_rows, chunk,
                                  jnp.asarray(fill, chunk.dtype))
            accumulate(chunk)

    if mask_possible:
        block_clean = row_start + tile_n <= n_rows

        @pl.when(block_clean)
        def _fast():
            run(masked=False)

        @pl.when(jnp.logical_not(block_clean))
        def _tail():
            run(masked=True)
    else:
        run(masked=False)

    # Single cross-sublane (XLU) reduce + store only at the end of the sweep.
    @pl.when(n == pl.num_programs(1) - 1)
    def _finalize():
        red = jnp.max(acc_ref[...], axis=0, keepdims=True)        # (1, F)
        o_ref[...] = red.reshape(o_ref.shape).astype(o_ref.dtype)


def message_max_agg(M):
    """Pallas equivalent of MessageMaxAgg().forward(M) for 2-D M: max over axis 0."""
    N, F = M.shape
    if N == 0:
        # torch.max over an empty dim raises as well.
        raise ValueError("message_max_agg: reduction over an empty dimension")
    dtype = jnp.dtype(M.dtype)
    itemsize = dtype.itemsize
    fill = _lowest(dtype)

    # Sublane packing: 8 rows per 32-bit sublane group (16 for bf16, 32 for i8).
    sub = 8 * max(1, 4 // itemsize)

    # In-kernel chunk of ~256 KiB (>= 4 sublane groups): rolled pl.loop keeps
    # generated code small while the streamed DMA tile stays large.
    row_bytes = F * itemsize
    chunk_rows = _round_up(max(4 * sub, (256 * 1024) // max(1, row_bytes)), sub)

    # ~12 MiB streamed per grid step (double-buffered ~24 MiB under a 40 MiB
    # vmem limit): fits every generation incl. v7x's 64 MiB physical VMEM and
    # keeps the ~0.35 us/step overhead <10% even at v7x HBM rates.
    tile_budget_bytes = 12 * 1024 * 1024
    budget_rows = max(
        chunk_rows,
        (tile_budget_bytes // max(1, row_bytes)) // chunk_rows * chunk_rows)

    # Split the reduction axis across a leading "parallel" grid axis (both v7x
    # TensorCores stream half the rows each; ~free serial loop on v5e/v6e).
    n_splits = 2 if N >= 2 * chunk_rows else 1

    rows_per_split = pl.cdiv(N, n_splits)
    tile_n = min(budget_rows, _round_up(rows_per_split, chunk_rows))
    num_row_blocks = pl.cdiv(N, tile_n)
    grid_n = pl.cdiv(num_row_blocks, n_splits)

    has_phantom = (n_splits * grid_n) != num_row_blocks
    mask_possible = has_phantom or (N % tile_n != 0)

    if has_phantom:
        # Clamp trailing (fully masked) blocks of the last split onto the last
        # real block so no DMA ever reads out of bounds.
        def in_index_map(s, n):
            return (jnp.minimum(s * grid_n + n, num_row_blocks - 1), 0)
    else:
        def in_index_map(s, n):
            return (s * grid_n + n, 0)

    kernel = functools.partial(
        _max_agg_kernel,
        n_rows=N, tile_n=tile_n, chunk_rows=chunk_rows, sub=sub,
        grid_n=grid_n, mask_possible=mask_possible, fill=fill)

    out = pl.pallas_call(
        kernel,
        out_shape=jax.ShapeDtypeStruct((n_splits, 1, F), dtype),
        grid_spec=pltpu.PrefetchScalarGridSpec(
            num_scalar_prefetch=0,
            grid=(n_splits, grid_n),            # reduction axis last
            in_specs=[pl.BlockSpec((tile_n, F), in_index_map)],
            out_specs=pl.BlockSpec((1, 1, F), lambda s, n: (s, 0, 0)),
            scratch_shapes=[pltpu.VMEM((sub, F), dtype)],
        ),
        compiler_params=pltpu.CompilerParams(
            dimension_semantics=("parallel", "arbitrary"),
            vmem_limit_bytes=40 * 1024 * 1024,
        ),
        cost_estimate=pl.CostEstimate(
            flops=N * F,
            transcendentals=0,
            bytes_accessed=N * F * itemsize + n_splits * F * itemsize),
    )(M)

    # Tiny epilogue: combine the per-split partial maxima.
    return jnp.max(out.reshape(n_splits, F), axis=0)


if __name__ == "__main__":
    key = jax.random.PRNGKey(0)
    # N deliberately NOT a multiple of the row tile -> exercises the -inf tail
    # mask; with two row-splits each TensorCore gets a contiguous half.
    N, F = 1003, 256
    M = jax.random.normal(key, (N, F), dtype=jnp.float32)

    c = message_max_agg(M)
    jax.block_until_ready(c)

    # Correctness check against plain JAX reference (== torch.max(M, 0)[0]).
    ref = jnp.max(M, axis=0)
    assert c.shape == ref.shape
    assert jnp.allclose(c, ref), "mismatch vs reference max-reduction"

    print("KERNEL_OK")
</pallas_src>

<mosaic_0001>
module attributes {stable_mosaic.version = 11 : i64} {
  func.func @_max_agg_kernel(%arg0: i32, %arg1: i32, %arg2: memref<512x256xf32, #tpu.memory_space<vmem>>, %arg3: memref<1x1x256xf32, #tpu.memory_space<vmem>>, %arg4: memref<8x256xf32, #tpu.memory_space<vmem>>) attributes {dimension_semantics = [#tpu.dimension_semantics<parallel>, #tpu.dimension_semantics<arbitrary>], iteration_bounds = array<i64: 2, 1>, scalar_prefetch = 0 : i64, scratch_operands = 1 : i64, tpu.core_type = #tpu.core_type<tc>, window_params = [{transform_indices = @transform_0, window_bounds = array<i64: 512, 256>}, {transform_indices = @transform_1, window_bounds = array<i64: 1, 1, 256>}]} {
    %c0_i32 = arith.constant 0 : i32
    %0 = arith.cmpi eq, %arg1, %c0_i32 : i32
    %1 = arith.extui %0 : i1 to i32
    %c0_i32_0 = arith.constant 0 : i32
    %2 = arith.cmpi ne, %1, %c0_i32_0 : i32
    scf.if %2 {
      %cst = arith.constant 0xFF800000 : f32
      %16 = vector.broadcast %cst : f32 to vector<8x256xf32>
      %c0 = arith.constant 0 : index
      %c0_6 = arith.constant 0 : index
      %17 = vector.load %arg4[%c0, %c0_6] : memref<8x256xf32, #tpu.memory_space<vmem>>, vector<8x256xf32>
      tpu.vector_store %arg4[%c0, %c0_6], %16 {strides = array<i32>} : memref<8x256xf32, #tpu.memory_space<vmem>>, vector<8x256xf32>,
    } else {
    }
    %c1_i32 = arith.constant 1 : i32
    %3 = arith.muli %arg0, %c1_i32 : i32
    %4 = arith.addi %3, %arg1 : i32
    %c512_i32 = arith.constant 512 : i32
    %5 = arith.muli %4, %c512_i32 : i32
    %c512_i32_1 = arith.constant 512 : i32
    %6 = arith.addi %5, %c512_i32_1 : i32
    %c1003_i32 = arith.constant 1003 : i32
    %7 = arith.cmpi sle, %6, %c1003_i32 : i32
    %8 = arith.extui %7 : i1 to i32
    %c0_i32_2 = arith.constant 0 : i32
    %9 = arith.cmpi ne, %8, %c0_i32_2 : i32
    scf.if %9 {
      %c0_i32_6 = arith.constant 0 : i32
      %c2_i32 = arith.constant 2 : i32
      %16 = arith.addi %c0_i32_6, %c2_i32 : i32
      %c1_i32_7 = arith.constant 1 : i32
      scf.for %arg5 = %c0_i32_6 to %16 step %c1_i32_7  : i32 {
        %c1_i32_9 = arith.constant 1 : i32
        %17 = arith.muli %arg5, %c1_i32_9 : i32
        %c0_i32_10 = arith.constant 0 : i32
        %18 = arith.addi %c0_i32_10, %17 : i32
        %c256_i32 = arith.constant 256 : i32
        %19 = arith.muli %18, %c256_i32 : i32
        %20 = tpu.assume_multiple %19, 8 : i32
        %21 = arith.index_cast %20 : i32 to index
        %c0 = arith.constant 0 : index
        %22 = vector.load %arg2[%21, %c0] : memref<512x256xf32, #tpu.memory_space<vmem>>, vector<256x256xf32>
        %23 = vector.shape_cast %22 : vector<256x256xf32> to vector<32x8x256xf32>
        %cst = arith.constant dense<0xFF800000> : vector<8x256xf32>
        %24 = vector.multi_reduction <maximumf>, %23, %cst [0] : vector<32x8x256xf32> to vector<8x256xf32>
        %c0_11 = arith.constant 0 : index
        %c0_12 = arith.constant 0 : index
        %25 = vector.load %arg4[%c0_11, %c0_12] : memref<8x256xf32, #tpu.memory_space<vmem>>, vector<8x256xf32>
        %26 = arith.maximumf %25, %24 : vector<8x256xf32>
        %c0_13 = arith.constant 0 : index
        %c0_14 = arith.constant 0 : index
        %27 = vector.load %arg4[%c0_13, %c0_14] : memref<8x256xf32, #tpu.memory_space<vmem>>, vector<8x256xf32>
        tpu.vector_store %arg4[%c0_13, %c0_14], %26 {strides = array<i32>} : memref<8x256xf32, #tpu.memory_space<vmem>>, vector<8x256xf32>,
      }
      %c2_i32_8 = arith.constant 2 : i32
    } else {
    }
    %true = arith.constant true
    %10 = arith.xori %7, %true : i1
    %11 = arith.extui %10 : i1 to i32
    %c0_i32_3 = arith.constant 0 : i32
    %12 = arith.cmpi ne, %11, %c0_i32_3 : i32
    scf.if %12 {
      %c0_i32_6 = arith.constant 0 : i32
      %c2_i32 = arith.constant 2 : i32
      %16 = arith.addi %c0_i32_6, %c2_i32 : i32
      %c1_i32_7 = arith.constant 1 : i32
      scf.for %arg5 = %c0_i32_6 to %16 step %c1_i32_7  : i32 {
        %c1_i32_9 = arith.constant 1 : i32
        %17 = arith.muli %arg5, %c1_i32_9 : i32
        %c0_i32_10 = arith.constant 0 : i32
        %18 = arith.addi %c0_i32_10, %17 : i32
        %c256_i32 = arith.constant 256 : i32
        %19 = arith.muli %18, %c256_i32 : i32
        %20 = tpu.assume_multiple %19, 8 : i32
        %21 = arith.index_cast %20 : i32 to index
        %c0 = arith.constant 0 : index
        %22 = vector.load %arg2[%21, %c0] : memref<512x256xf32, #tpu.memory_space<vmem>>, vector<256x256xf32>
        %23 = tpu.iota {dimensions = array<i32: 0>} : vector<256x256xi32>
        %c256_i32_11 = arith.constant 256 : i32
        %24 = arith.muli %18, %c256_i32_11 : i32
        %25 = arith.addi %5, %24 : i32
        %26 = vector.broadcast %25 : i32 to vector<256x256xi32>
        %27 = arith.addi %23, %26 : vector<256x256xi32>
        %c1003_i32_12 = arith.constant 1003 : i32
        %28 = vector.broadcast %c1003_i32_12 : i32 to vector<256x256xi32>
        %29 = arith.cmpi slt, %27, %28 : vector<256x256xi32>
        %cst = arith.constant 0xFF800000 : f32
        %30 = vector.broadcast %cst : f32 to vector<256x256xf32>
        %31 = arith.select %29, %22, %30 : vector<256x256xi1>, vector<256x256xf32>
        %32 = vector.shape_cast %31 : vector<256x256xf32> to vector<32x8x256xf32>
        %cst_13 = arith.constant dense<0xFF800000> : vector<8x256xf32>
        %33 = vector.multi_reduction <maximumf>, %32, %cst_13 [0] : vector<32x8x256xf32> to vector<8x256xf32>
        %c0_14 = arith.constant 0 : index
        %c0_15 = arith.constant 0 : index
        %34 = vector.load %arg4[%c0_14, %c0_15] : memref<8x256xf32, #tpu.memory_space<vmem>>, vector<8x256xf32>
        %35 = arith.maximumf %34, %33 : vector<8x256xf32>
        %c0_16 = arith.constant 0 : index
        %c0_17 = arith.constant 0 : index
        %36 = vector.load %arg4[%c0_16, %c0_17] : memref<8x256xf32, #tpu.memory_space<vmem>>, vector<8x256xf32>
        tpu.vector_store %arg4[%c0_16, %c0_17], %35 {strides = array<i32>} : memref<8x256xf32, #tpu.memory_space<vmem>>, vector<8x256xf32>,
      }
      %c2_i32_8 = arith.constant 2 : i32
    } else {
    }
    %c0_i32_4 = arith.constant 0 : i32
    %13 = arith.cmpi eq, %arg1, %c0_i32_4 : i32
    %14 = arith.extui %13 : i1 to i32
    %c0_i32_5 = arith.constant 0 : i32
    %15 = arith.cmpi ne, %14, %c0_i32_5 : i32
    scf.if %15 {
      %c0 = arith.constant 0 : index
      %c0_6 = arith.constant 0 : index
      %16 = vector.load %arg4[%c0, %c0_6] : memref<8x256xf32, #tpu.memory_space<vmem>>, vector<8x256xf32>
      %cst = arith.constant dense<0xFF800000> : vector<256xf32>
      %17 = vector.multi_reduction <maximumf>, %16, %cst [0] : vector<8x256xf32> to vector<256xf32>
      %18 = vector.shape_cast %17 : vector<256xf32> to vector<1x256xf32>
      %19 = vector.shape_cast %18 : vector<1x256xf32> to vector<1x1x256xf32>
      %c0_7 = arith.constant 0 : index
      %c0_8 = arith.constant 0 : index
      %c0_9 = arith.constant 0 : index
      %20 = vector.load %arg3[%c0_7, %c0_8, %c0_9] : memref<1x1x256xf32, #tpu.memory_space<vmem>>, vector<1x1x256xf32>
      tpu.vector_store %arg3[%c0_7, %c0_8, %c0_9], %19 {strides = array<i32>} : memref<1x1x256xf32, #tpu.memory_space<vmem>>, vector<1x1x256xf32>,
    } else {
    }
    return
  }
  func.func @transform_0(%arg0: i32, %arg1: i32) -> (i32, i32) {
    %c1_i32 = arith.constant 1 : i32
    %0 = arith.muli %arg0, %c1_i32 : i32
    %1 = arith.addi %0, %arg1 : i32
    %c0_i32 = arith.constant 0 : i32
    %c0_i32_0 = arith.constant 0 : i32
    return %1, %c0_i32 : i32, i32
  }
  func.func @transform_1(%arg0: i32, %arg1: i32) -> (i32, i32, i32) {
    %c0_i32 = arith.constant 0 : i32
    %c0_i32_0 = arith.constant 0 : i32
    %c0_i32_1 = arith.constant 0 : i32
    return %arg0, %c0_i32, %c0_i32_0 : i32, i32, i32
  }
}

</mosaic_0001>

<bundles_post_ra>
// kernel: tpu_custom_call.1
= control target key start
LH: loop header
LB: loop body
LE: loop exit
PB: predicated region body
PF: predicated region fallthrough
CT: control target
= control target key end

     0   :  { %6 = vsyncpa [#allocation4], 0  ;;  %s1691_s0 = inlined_call_operand.hbm [shape: f32[1003,256], index: 0, kind: input, shape index: {}]   ;;  %s1692_s1 = inlined_call_operand.hbm [shape: f32[2,1,256], index: 1, kind: output, shape index: {}]  }
   0x1   :  { %8 = vsyncpa [#allocation4 + $0x1], 0 }
   0x2   :  { %9 = vsyncpa [#allocation5], 0 }
   0x3   :  { %11 = vsyncpa [#allocation5 + $0x1], 0  ;;  %s1037_s6 = smov 0   ;;  %s1039_s7 = smov 0  }
   0x4   :  { %s1041_s8 = smov 0   ;;  %s1043_s9 = smov 0  }
   0x5   :  { %s1045_s10 = smov 0   ;;  %s1047_s11 = smov 0  }
   0x6 LB: > { %s781_s12 = sadd.s32 4294967295, %s1011_s11   ;;  %s782_s13 = sadd.s32 4294967294, %s1011_s11   ;;  %s1011_s11 = sphi %s1047_s11, %s17_s11   ;;  %s1007_s10 = sphi %s1045_s10, %s1703_s10   ;;  %s1003_s9 = sphi %s1043_s9, %s1702_s9   ;;  %s999_s8 = sphi %s1041_s8, %s1701_s8   ;;  %s995_s7 = sphi %s1039_s7, %s1700_s7   ;;  %s991_s6 = sphi %s1037_s6, %s1699_s6  }
   0x7   : > { %s29_s14 = sadd.s32 1, %s1007_s10  ;;  %s38_s15 = sadd.s32 1, %s999_s8 }
   0x8   : > { %p31_p0 = scmp.ge.s32.totalorder %s29_s14, 2  ;;  %p45_p1 = scmp.ne.s32.totalorder %s999_s8, %s995_s7 }
   0x9   : > { %p46_p2 = scmp.eq.s32.totalorder %s1011_s11, 0  ;;  %p51_p3 = scmp.ne.s32.totalorder %s995_s7, %s991_s6 }
   0xa   : > { %s1705_s14 = smov (%p31_p0, %s29_s14), 0  ;;  %p52_p5 = scmp.eq.s32.totalorder %s781_s12, 0 }
   0xb   : > { %p47_p4 = por %p46_p2, %p45_p1  ;;  %s35_s16 = ssub.s32 %s1007_s10, %s1705_s14 }
   0xc   : > { %p75_p6 = scmp.eq.s32.totalorder %s781_s12, 1  ;;  %p36_p7 = scmp.eq.s32.totalorder %s35_s16, 0 }
   0xd   : > { %p1080_p8 = por %p52_p5, %p51_p3  ;;  %p81_p10 = scmp.eq.s32.totalorder %s782_s13, 1 }
   0xe   : > { %p1084_p9 = por %p75_p6, %p45_p1  ;;  %p1693_p12 = scmp.ge.s32.totalorder %s1011_s11, 2 }
   0xf   : > { %s1089_s19 = scalar_select %p36_p7, %s999_s8, %s38_s15  }
  0x10   : > { %p1091_p11 = por %p81_p10, %p51_p3  ;;  %97 = sbr.rel (%p1693_p12) target bundleno = 58 (0x3a), region = 16 }
  0x12   : > { %s1696_s20 = scalar_select %p1091_p11, 1, 0 }
  0x17   : > { %100 = sbr.rel (!%p47_p4) target bundleno = 58 (0x3a), region = 20  ;;  %s101_s21 = sand.u32 (%p47_p4), 1, %s999_s8  }
  0x18   : > { %s786_s22 = sshll.u32 (%p47_p4), %s1007_s10, 6  ;;  %s785_s23 = sshll.u32 (%p47_p4), %s101_s21, 10 }
  0x19   : > { %s108_s24 = ssub.s32 (%p47_p4), 126, %s786_s22  ;;  %s1103_s27 = scalar_lea.sflag (%p47_p4), [#allocation4], %s101_s21 }
  0x1a   : > { %p109_p13 = scmp.lt.s32.totalorder (%p47_p4), %s108_s24, 64  ;;  %s105_s28 = scalar_lea.vmem (%p47_p4), [#allocation3], %s785_s23 }
  0x1e   : > { %s1707_s24 = smov (!%p109_p13, %s108_s24), 64 }
  0x1f   : > { %s1100_s25 = sshll.u32 %s1707_s24, 8 }
  0x20   : > { %s114_s26 = ssub.s32 16384, %s1100_s25 }
  0x21   : > { %115 = vsyncadd %s1103_s27, %s114_s26  ;;  %p789_p0 = scmp.ne.s32.totalorder %s1100_s25, 0  ;;  %s813_s29 = sshll.u32 %s1007_s10, 14 }
  0x22   : > { %s1111_s3 = scalar_lea.hbm %s1691_s0, %s813_s29  ;;  %s121_s4 = sshll.u32 %s105_s28, 4  ;;  %s1113_s4 = int_to_ptr.vmem [resolvable:$true] %s121_s4 }
  0x23   : > { %s893_s5 = scalar_lea.hbm %s1111_s3, %s1100_s25  ;;  %s897_s15 = scalar_lea.hbm %s1691_s0, 32256 }
  0x24   : > { %p894_p1 = scmp.ne.s32.totalorder %s1111_s3, %s893_s5  ;;  %p898_p4 = scmp.lt.u32.totalorder %s1111_s3, %s1691_s0 }
  0x25   : > { %p899_p5 = scmp.lt.u32.totalorder %s897_s15, %s893_s5  ;;  %p901_p7 = scmp.lt.u32.totalorder %s893_s5, %s1111_s3 }
  0x26   : > { %p895_p2 = pnand %p894_p1, %p789_p0 }
  0x27   : > { %p900_p6 = por %p899_p5, %p898_p4 }
  0x28   : > { %p896_p3 = pneg %p895_p2 }
  0x29   : > { %p902_p10 = por %p901_p7, %p900_p6 }
  0x2b   : > { %p903_p13 = pnand %p902_p10, %p896_p3 }
  0x2d   : > { %906 = shalt.err (!%p903_p13)
}
  0x2e   : > { %s907_s22 = scalar_lea.vmem %s1113_s4, %s1100_s25  ;;  %s1021_s23 = smov [#allocation3]  }
  0x2f   : > { %p908_p1 = scmp.ne.s32.totalorder %s1113_s4, %s907_s22  ;;  %s911_s24 = sshll.u32 %s1021_s23, 4  ;;  %s912_s24 = int_to_ptr.vmem [resolvable:$false] %s911_s24 }
  0x30   : > { %s913_s26 = scalar_lea.vmem %s912_s24, 32768  ;;  %p914_p11 = scmp.lt.s32.totalorder %s1113_s4, %s912_s24 }
  0x31   : > { %p909_p2 = pnand %p908_p1, %p789_p0  ;;  %p915_p4 = scmp.lt.s32.totalorder %s913_s26, %s907_s22 }
  0x33   : > { %p910_p12 = pneg %p909_p2  ;;  %p916_p5 = por %p915_p4, %p914_p11 }
  0x35   : > { %p917_p6 = pnand %p916_p5, %p910_p12 }
  0x37   : > { %920 = shalt.err (!%p917_p6)
}
  0x38   : > { %s1022_s28 = smov 256   ;;  %s1023_s29 = smov 16  }
  0x39   : > { %127 = dma.hbm_to_vmem [thread:$0]  (%p789_p0), %s1111_s3, %s1100_s25, %s1113_s4, %s1103_s27, %s1022_s28, %s1022_s28, %s1023_s29  }
  0x3a PF: > { %p794_p3 = scmp.ge.s32.totalorder %s1011_s11, 1  ;;  %p129_p7 = scmp.lt.s32.totalorder %s1011_s11, 3 }
  0x3c   : > { %p130_p10 = pnand %p794_p3, %p129_p7 }
  0x3d   : > { %s1143_s30 = sand.u32 (!%p130_p10), 1, %s995_s7  }
  0x3e   : > { %133 = sbr.rel (%p130_p10) target bundleno = 270 (0x10e), region = 24  ;;  %s795_s2 = sshll.u32 (!%p130_p10), %s1143_s30, 10 }
  0x3f   : > { %s136_s5 = scalar_lea.sflag (!%p130_p10), [#allocation4], %s1143_s30  ;;  %s1147_s12 = scalar_lea.vmem (!%p130_p10), [#allocation3], %s795_s2 }
  0x45   : > { %982 = dma.done.wait (%p1080_p8), %s136_s5, 16384  }
  0x46   : > { %984 = vsyncadd (%p1080_p8), %s136_s5, 4294950912  ;;  %s796_s25 = sshll.u32 %s1143_s30, 1  ;;  %s797_s27 = sshll.u32 %s1003_s9, 9  ;;  %v1024_v0 = vmov -inf  }
  0x47   : > { %169 = vst [vmem:[#allocation2] sm:$0xff] %v1024_v0  ;;  %170 = vst [vmem:[#allocation2 + $0x8] sm:$0xff] %v1024_v0  ;;  %s1157_s3 = sadd.s32 512, %s797_s27  ;;  %s1159_s4 = scalar_lea.vmem [#allocation6], %s796_s25 }
  0x48   : > { %p798_p11 = scmp.gt.s32.totalorder %s1157_s3, 1003 }
  0x49   : > { %s1162_s13 = smov (!%p798_p11), 0  }
  0x4a   : > { %177 = sbr.rel (%p798_p11) target bundleno = 148 (0x94), region = 36 }
  0x51 LB: >> { %s799_s17 = sshll.u32 %s1015_s13, 8  ;;  %s183_s13 = sadd.s32 1, %s1015_s13   ;;  %s1015_s13 = sphi %s1162_s13, %s183_s13  }
  0x52   : >> { %s185_s15 = sshra.s32 %s799_s17, 3  ;;  %p180_p8 = scmp.ge.s32.totalorder %s183_s13, 2  }
  0x53   : >> { %s814_s16 = sshll.u32 %s185_s15, 4 }
  0x54   : >> { %s1169_s21 = scalar_lea.vmem %s1147_s12, %s814_s16 [#allocation3] }
  0x55   : >> { %v190_v1 = vld [vmem:[%s1169_s21] sm:$0xff]  ;;  %v192_v2 = vld [vmem:[%s1169_s21 + $0x10] sm:$0xff]  ;;  %v199_v7 = vld [vmem:[%s1169_s21 + $0x48] sm:$0xff] }
  0x56   : >> { %v194_v3 = vld [vmem:[%s1169_s21 + $0x20] sm:$0xff]  ;;  %v196_v4 = vld [vmem:[%s1169_s21 + $0x30] sm:$0xff]  ;;  %v201_v9 = vld [vmem:[%s1169_s21 + $0x58] sm:$0xff] }
  0x57   : >> { %v198_v5 = vld [vmem:[%s1169_s21 + $0x40] sm:$0xff]  ;;  %v254_v6 = vmax.f32 %v190_v1, %v194_v3  ;;  %v200_v8 = vld [vmem:[%s1169_s21 + $0x50] sm:$0xff]  ;;  %v255_v10 = vmax.f32 %v192_v2, %v196_v4  ;;  %v287_v11 = vmax.f32 %v201_v9, %v199_v7  ;;  %v203_v13 = vld [vmem:[%s1169_s21 + $0x68] sm:$0xff] }
  0x58   : >> { %v202_v12 = vld [vmem:[%s1169_s21 + $0x60] sm:$0xff]  ;;  %v204_v14 = vld [vmem:[%s1169_s21 + $0x70] sm:$0xff]  ;;  %v205_v16 = vld [vmem:[%s1169_s21 + $0x78] sm:$0xff] }
  0x59   : >> { %v256_v15 = vmax.f32 %v254_v6, %v198_v5  ;;  %v206_v17 = vld [vmem:[%s1169_s21 + $0x80] sm:$0xff]  ;;  %v257_v18 = vmax.f32 %v255_v10, %v200_v8  ;;  %v288_v19 = vmax.f32 %v203_v13, %v287_v11  ;;  %v208_v20 = vld [vmem:[%s1169_s21 + $0x90] sm:$0xff]  ;;  %v207_v22 = vld [vmem:[%s1169_s21 + $0x88] sm:$0xff] }
  0x5a   : >> { %v210_v23 = vld [vmem:[%s1169_s21 + $0xa0] sm:$0xff]  ;;  %v212_v26 = vld [vmem:[%s1169_s21 + $0xb0] sm:$0xff]  ;;  %v209_v28 = vld [vmem:[%s1169_s21 + $0x98] sm:$0xff] }
  0x5b   : >> { %v258_v21 = vmax.f32 %v256_v15, %v202_v12  ;;  %v259_v24 = vmax.f32 %v257_v18, %v204_v14  ;;  %v289_v25 = vmax.f32 %v205_v16, %v288_v19  ;;  %v214_v29 = vld [vmem:[%s1169_s21 + $0xc0] sm:$0xff]  ;;  %v216_v32 = vld [vmem:[%s1169_s21 + $0xd0] sm:$0xff]  ;;  %v211_v34 = vld [vmem:[%s1169_s21 + $0xa8] sm:$0xff] }
  0x5c   : >> { %v218_v35 = vld [vmem:[%s1169_s21 + $0xe0] sm:$0xff]  ;;  %v220_v38 = vld [vmem:[%s1169_s21 + $0xf0] sm:$0xff]  ;;  %v213_v40 = vld [vmem:[%s1169_s21 + $0xb8] sm:$0xff] }
  0x5d   : >> { %v260_v27 = vmax.f32 %v258_v21, %v206_v17  ;;  %v261_v30 = vmax.f32 %v259_v24, %v208_v20  ;;  %v290_v31 = vmax.f32 %v207_v22, %v289_v25  ;;  %v222_v41 = vld [vmem:[%s1169_s21 + $0x100] sm:$0xff]  ;;  %v224_v44 = vld [vmem:[%s1169_s21 + $0x110] sm:$0xff]  ;;  %v215_v46 = vld [vmem:[%s1169_s21 + $0xc8] sm:$0xff] }
  0x5e   : >> { %v226_v47 = vld [vmem:[%s1169_s21 + $0x120] sm:$0xff]  ;;  %v228_v50 = vld [vmem:[%s1169_s21 + $0x130] sm:$0xff]  ;;  %v217_v52 = vld [vmem:[%s1169_s21 + $0xd8] sm:$0xff] }
  0x5f   : >> { %v262_v33 = vmax.f32 %v260_v27, %v210_v23  ;;  %v263_v36 = vmax.f32 %v261_v30, %v212_v26  ;;  %v291_v37 = vmax.f32 %v209_v28, %v290_v31  ;;  %v230_v53 = vld [vmem:[%s1169_s21 + $0x140] sm:$0xff]  ;;  %v232_v56 = vld [vmem:[%s1169_s21 + $0x150] sm:$0xff]  ;;  %v219_v58 = vld [vmem:[%s1169_s21 + $0xe8] sm:$0xff] }
  0x60   : >> { %v234_v59 = vld [vmem:[%s1169_s21 + $0x160] sm:$0xff]  ;;  %v236_v62 = vld [vmem:[%s1169_s21 + $0x170] sm:$0xff]  ;;  %v221_v0 = vld [vmem:[%s1169_s21 + $0xf8] sm:$0xff] }
  0x61   : >> { %v264_v39 = vmax.f32 %v262_v33, %v214_v29  ;;  %v265_v42 = vmax.f32 %v263_v36, %v216_v32  ;;  %v292_v43 = vmax.f32 %v211_v34, %v291_v37  ;;  %v238_v1 = vld [vmem:[%s1169_s21 + $0x180] sm:$0xff]  ;;  %v240_v4 = vld [vmem:[%s1169_s21 + $0x190] sm:$0xff]  ;;  %v223_v6 = vld [vmem:[%s1169_s21 + $0x108] sm:$0xff] }
  0x62   : >> { %v242_v7 = vld [vmem:[%s1169_s21 + $0x1a0] sm:$0xff]  ;;  %v244_v10 = vld [vmem:[%s1169_s21 + $0x1b0] sm:$0xff]  ;;  %v225_v12 = vld [vmem:[%s1169_s21 + $0x118] sm:$0xff] }
  0x63   : >> { %v266_v45 = vmax.f32 %v264_v39, %v218_v35  ;;  %v267_v48 = vmax.f32 %v265_v42, %v220_v38  ;;  %v293_v49 = vmax.f32 %v213_v40, %v292_v43  ;;  %v246_v13 = vld [vmem:[%s1169_s21 + $0x1c0] sm:$0xff]  ;;  %v248_v16 = vld [vmem:[%s1169_s21 + $0x1d0] sm:$0xff]  ;;  %v227_v18 = vld [vmem:[%s1169_s21 + $0x128] sm:$0xff] }
  0x64   : >> { %v250_v19 = vld [vmem:[%s1169_s21 + $0x1e0] sm:$0xff]  ;;  %v252_v22 = vld [vmem:[%s1169_s21 + $0x1f0] sm:$0xff]  ;;  %v229_v24 = vld [vmem:[%s1169_s21 + $0x138] sm:$0xff] }
  0x65   : >> { %v268_v51 = vmax.f32 %v266_v45, %v222_v41  ;;  %v269_v54 = vmax.f32 %v267_v48, %v224_v44  ;;  %v294_v55 = vmax.f32 %v215_v46, %v293_v49  ;;  %v231_v28 = vld [vmem:[%s1169_s21 + $0x148] sm:$0xff]  ;;  %v316_v31 = vld [vmem:[#allocation2] sm:$0xff]  ;;  %v233_v32 = vld [vmem:[%s1169_s21 + $0x158] sm:$0xff] }
  0x66   : >> { %v235_v35 = vld [vmem:[%s1169_s21 + $0x168] sm:$0xff]  ;;  %v237_v38 = vld [vmem:[%s1169_s21 + $0x178] sm:$0xff] }
  0x67   : >> { %v270_v57 = vmax.f32 %v268_v51, %v226_v47  ;;  %v271_v60 = vmax.f32 %v269_v54, %v228_v50  ;;  %v295_v61 = vmax.f32 %v217_v52, %v294_v55  ;;  %v239_v40 = vld [vmem:[%s1169_s21 + $0x188] sm:$0xff]  ;;  %v241_v42 = vld [vmem:[%s1169_s21 + $0x198] sm:$0xff] }
  0x68   : >> { %v243_v44 = vld [vmem:[%s1169_s21 + $0x1a8] sm:$0xff]  ;;  %v245_v46 = vld [vmem:[%s1169_s21 + $0x1b8] sm:$0xff] }
  0x69   : >> { %v272_v63 = vmax.f32 %v270_v57, %v230_v53  ;;  %v273_v2 = vmax.f32 %v271_v60, %v232_v56  ;;  %v296_v3 = vmax.f32 %v219_v58, %v295_v61  ;;  %v247_v48 = vld [vmem:[%s1169_s21 + $0x1c8] sm:$0xff]  ;;  %v249_v50 = vld [vmem:[%s1169_s21 + $0x1d8] sm:$0xff] }
  0x6a   : >> { %v191_v52 = vld [vmem:[%s1169_s21 + $0x8] sm:$0xff]  ;;  %v193_v56 = vld [vmem:[%s1169_s21 + $0x18] sm:$0xff] }
  0x6b   : >> { %v274_v5 = vmax.f32 %v272_v63, %v234_v59  ;;  %v275_v8 = vmax.f32 %v273_v2, %v236_v62  ;;  %v297_v9 = vmax.f32 %v221_v0, %v296_v3  ;;  %v195_v53 = vld [vmem:[%s1169_s21 + $0x28] sm:$0xff]  ;;  %v197_v57 = vld [vmem:[%s1169_s21 + $0x38] sm:$0xff] }
  0x6c   : >> { %v251_v54 = vld [vmem:[%s1169_s21 + $0x1e8] sm:$0xff]  ;;  %v253_v58 = vld [vmem:[%s1169_s21 + $0x1f8] sm:$0xff]  ;;  %v285_v60 = vmax.f32 %v191_v52, %v195_v53  ;;  %v286_v62 = vmax.f32 %v193_v56, %v197_v57 }
  0x6d   : >> { %v276_v11 = vmax.f32 %v274_v5, %v238_v1  ;;  %v277_v14 = vmax.f32 %v275_v8, %v240_v4  ;;  %v298_v15 = vmax.f32 %v223_v6, %v297_v9  ;;  %v317_v0 = vld [vmem:[#allocation2 + $0x8] sm:$0xff] }
  0x6f   : >> { %v278_v17 = vmax.f32 %v276_v11, %v242_v7  ;;  %v279_v20 = vmax.f32 %v277_v14, %v244_v10  ;;  %v299_v21 = vmax.f32 %v225_v12, %v298_v15 }
  0x71   : >> { %v280_v23 = vmax.f32 %v278_v17, %v246_v13  ;;  %v281_v25 = vmax.f32 %v279_v20, %v248_v16  ;;  %v300_v26 = vmax.f32 %v227_v18, %v299_v21 }
  0x73   : >> { %v282_v27 = vmax.f32 %v280_v23, %v250_v19  ;;  %v283_v29 = vmax.f32 %v281_v25, %v252_v22  ;;  %v301_v30 = vmax.f32 %v229_v24, %v300_v26 }
  0x75   : >> { %v284_v33 = vmax.f32 %v282_v27, %v283_v29  ;;  %v302_v34 = vmax.f32 %v231_v28, %v301_v30 }
  0x77   : >> { %v318_v36 = vmax.f32 %v316_v31, %v284_v33  ;;  %v303_v37 = vmax.f32 %v233_v32, %v302_v34 }
  0x79   : >> { %320 = vst [vmem:[#allocation2] sm:$0xff] %v318_v36  ;;  %v304_v39 = vmax.f32 %v235_v35, %v303_v37 }
  0x7b   : >> { %v305_v41 = vmax.f32 %v237_v38, %v304_v39 }
  0x7d   : >> { %v306_v43 = vmax.f32 %v239_v40, %v305_v41 }
  0x7f   : >> { %v307_v45 = vmax.f32 %v241_v42, %v306_v43 }
  0x81   : >> { %v308_v47 = vmax.f32 %v243_v44, %v307_v45 }
  0x83   : >> { %v309_v49 = vmax.f32 %v245_v46, %v308_v47 }
  0x85   : >> { %v310_v51 = vmax.f32 %v247_v48, %v309_v49 }
  0x87   : >> { %v311_v55 = vmax.f32 %v249_v50, %v310_v51 }
  0x89   : >> { %v312_v59 = vmax.f32 %v251_v54, %v311_v55 }
  0x8b   : >> { %v313_v61 = vmax.f32 %v253_v58, %v312_v59 }
  0x8d   : >> { %v314_v63 = vmax.f32 %v285_v60, %v313_v61  ;;  %182 = sbr.rel (!%p180_p8) target bundleno = 81 (0x51), region = 101 }
  0x8f   : >> { %v315_v1 = vmax.f32 %v286_v62, %v314_v63 }
  0x91   : >> { %v319_v2 = vmax.f32 %v317_v0, %v315_v1 }
  0x93   : >> { %321 = vst [vmem:[#allocation2 + $0x8] sm:$0xff] %v319_v2 }
  0x94 PF: > { %p802_p12 = scmp.le.s32.totalorder %s1157_s3, 1003 }
  0x95   : > { %s1239_s22 = smov (!%p802_p12), 0  }
  0x96   : > { %325 = sbr.rel (%p802_p12) target bundleno = 231 (0xe7), region = 47 }
  0x9d LB: >> { %v402_v3 = vlaneseq  ;;  %s803_s23 = sshll.u32 %s1019_s22, 8  ;;  %s331_s22 = sadd.s32 1, %s1019_s22   ;;  %s1019_s22 = sphi %s1239_s22, %s331_s22  }
  0x9e   : >> { %s435_s24 = sadd.s32 %s803_s23, %s797_s27  ;;  %s333_s26 = sshra.s32 %s803_s23, 3 }
  0x9f   : >> { %v1245_v4 = vshrl.u32 %v402_v3, 7  ;;  %v1252_v8 = vstv %s435_s24  ;;  %s815_s28 = sshll.u32 %s333_s26, 4  ;;  %p328_p0 = scmp.ge.s32.totalorder %s331_s22, 2  }
  0xa0   : >> { %s1263_s29 = scalar_lea.vmem %s1147_s12, %s815_s28 [#allocation3] }
  0xa1   : >> { %v407_v5 = vadd.s32 32, %v1245_v4  ;;  %v408_v6 = vadd.s32 40, %v1245_v4  ;;  %v409_v7 = vadd.s32 48, %v1245_v4  ;;  %v410_v9 = vadd.s32 56, %v1245_v4  ;;  %v347_v25 = vld [vmem:[%s1263_s29 + $0x48] sm:$0xff]  ;;  %v349_v26 = vld [vmem:[%s1263_s29 + $0x58] sm:$0xff] }
  0xa2   : >> { %v411_v10 = vadd.s32 64, %v1245_v4  ;;  %v404_v13 = vadd.s32 8, %v1245_v4  ;;  %v405_v14 = vadd.s32 16, %v1245_v4  ;;  %v406_v15 = vadd.s32 24, %v1245_v4  ;;  %v351_v29 = vld [vmem:[%s1263_s29 + $0x68] sm:$0xff]  ;;  %v353_v33 = vld [vmem:[%s1263_s29 + $0x78] sm:$0xff] }
  0xa3   : >> { %v1257_v11 = vadd.s32 %v1252_v8, %v407_v5  ;;  %v1260_v12 = vadd.s32 %v1252_v8, %v408_v6  ;;  %v1269_v16 = vadd.s32 %v1252_v8, %v409_v7  ;;  %v412_v17 = vadd.s32 72, %v1245_v4  ;;  %v355_v41 = vld [vmem:[%s1263_s29 + $0x88] sm:$0xff]  ;;  %v357_v49 = vld [vmem:[%s1263_s29 + $0x98] sm:$0xff] }
  0xa4   : >> { %v413_v18 = vadd.s32 80, %v1245_v4  ;;  %v414_v19 = vadd.s32 88, %v1245_v4  ;;  %v1275_v20 = vadd.s32 %v1252_v8, %v410_v9  ;;  %v415_v21 = vadd.s32 96, %v1245_v4  ;;  %v359_v57 = vld [vmem:[%s1263_s29 + $0xa8] sm:$0xff]  ;;  %v361_v1 = vld [vmem:[%s1263_s29 + $0xb8] sm:$0xff] }
  0xa5   : >> { %v416_v22 = vadd.s32 104, %v1245_v4  ;;  %v417_v23 = vadd.s32 112, %v1245_v4  ;;  %v1282_v24 = vadd.s32 %v1252_v8, %v1245_v4  ;;  %v418_v27 = vadd.s32 120, %v1245_v4 }
  0xa6   : >> { %v1288_v28 = vadd.s32 %v1252_v8, %v411_v10  ;;  %vm473_vm0 = vcmp.lt.s32.totalorder %v1257_v11, 1003  ;;  %vm474_vm1 = vcmp.lt.s32.totalorder %v1260_v12, 1003  ;;  %v419_v30 = vadd.s32 128, %v1245_v4  ;;  %v338_v10 = vld [vmem:[%s1263_s29] sm:$0xff] }
  0xa7   : >> { %v420_v31 = vadd.s32 136, %v1245_v4  ;;  %v1296_v32 = vadd.s32 %v1252_v8, %v404_v13  ;;  %vm475_vm2 = vcmp.lt.s32.totalorder %v1269_v16, 1003  ;;  %v421_v34 = vadd.s32 144, %v1245_v4  ;;  %v342_v13 = vld [vmem:[%s1263_s29 + $0x20] sm:$0xff] }
  0xa8   : >> { %v422_v35 = vadd.s32 152, %v1245_v4  ;;  %v1303_v36 = vadd.s32 %v1252_v8, %v412_v17  ;;  %vm476_vm3 = vcmp.lt.s32.totalorder %v1275_v20, 1003  ;;  %v423_v37 = vadd.s32 160, %v1245_v4  ;;  %v340_v17 = vld [vmem:[%s1263_s29 + $0x10] sm:$0xff] }
  0xa9   : >> { %v1308_v38 = vadd.s32 %v1252_v8, %v405_v14  ;;  %v510_v39 = vsel %vm473_vm0, %v347_v25, -inf  ;;  %v512_v40 = vsel %vm474_vm1, %v349_v26, -inf  ;;  %v1316_v42 = vadd.s32 %v1252_v8, %v413_v18  ;;  %v363_v14 = vld [vmem:[%s1263_s29 + $0xc8] sm:$0xff]  ;;  %v344_v18 = vld [vmem:[%s1263_s29 + $0x30] sm:$0xff] }
  0xaa   : >> { %vm477_vm4 = vcmp.lt.s32.totalorder %v1288_v28, 1003  ;;  %v598_v43 = vmax.f32 %v512_v40, %v510_v39  ;;  %v514_v44 = vsel %vm475_vm2, %v351_v29, -inf  ;;  %v424_v45 = vadd.s32 168, %v1245_v4  ;;  %v348_v29 = vld [vmem:[%s1263_s29 + $0x50] sm:$0xff]  ;;  %v367_v39 = vld [vmem:[%s1263_s29 + $0xe8] sm:$0xff] }
  0xab   : >> { %v425_v46 = vadd.s32 176, %v1245_v4  ;;  %v1324_v47 = vadd.s32 184, %v1245_v4  ;;  %v516_v48 = vsel %vm476_vm3, %v353_v33, -inf  ;;  %v1330_v50 = vadd.s32 %v1252_v8, %v406_v15 }
  0xac   : >> { %v1333_v51 = vadd.s32 %v1252_v8, %v414_v19  ;;  %vm478_vm5 = vcmp.lt.s32.totalorder %v1303_v36, 1003  ;;  %v599_v52 = vmax.f32 %v514_v44, %v598_v43  ;;  %v1337_v53 = vadd.s32 192, %v1245_v4  ;;  %v352_v43 = vld [vmem:[%s1263_s29 + $0x70] sm:$0xff] }
  0xad   : >> { %v1340_v54 = vadd.s32 200, %v1245_v4  ;;  %v1343_v55 = vadd.s32 208, %v1245_v4  ;;  %v518_v56 = vsel %vm477_vm4, %v355_v41, -inf  ;;  %v1349_v58 = vadd.s32 216, %v1245_v4 }
  0xae   : >> { %v1352_v59 = vadd.s32 %v1252_v8, %v415_v21  ;;  %vm479_vm6 = vcmp.lt.s32.totalorder %v1316_v42, 1003  ;;  %v600_v60 = vmax.f32 %v516_v48, %v599_v52  ;;  %v1356_v61 = vadd.s32 224, %v1245_v4 }
  0xaf   : >> { %v1359_v62 = vadd.s32 232, %v1245_v4  ;;  %v1362_v63 = vadd.s32 240, %v1245_v4  ;;  %v520_v0 = vsel %vm478_vm5, %v357_v49, -inf  ;;  %v1368_v2 = vadd.s32 248, %v1245_v4 }
  0xb0   : >> { %v1371_v3 = vadd.s32 %v1252_v8, %v416_v22  ;;  %vm480_vm7 = vcmp.lt.s32.totalorder %v1333_v51, 1003  ;;  %v601_v5 = vmax.f32 %v518_v56, %v600_v60  ;;  %v1375_v6 = vadd.s32 %v1252_v8, %v417_v23  ;;  %v346_v22 = vld [vmem:[%s1263_s29 + $0x40] sm:$0xff]  ;;  %v365_v23 = vld [vmem:[%s1263_s29 + $0xd8] sm:$0xff] }
  0xb1   : >> { %v1378_v7 = vadd.s32 %v1252_v8, %v418_v27  ;;  %v1381_v9 = vadd.s32 %v1252_v8, %v419_v30  ;;  %v522_v4 = vsel %vm479_vm6, %v359_v57, -inf  ;;  %vm469_vm8 = vcmp.lt.s32.totalorder %v1282_v24, 1003  ;;  %v354_v56 = vld [vmem:[%s1263_s29 + $0x80] sm:$0xff]  ;;  %v369_v57 = vld [vmem:[%s1263_s29 + $0xf8] sm:$0xff] }
  0xb2   : >> { %vm471_vm9 = vcmp.lt.s32.totalorder %v1308_v38, 1003  ;;  %vm481_vm10 = vcmp.lt.s32.totalorder %v1352_v59, 1003  ;;  %v602_v15 = vmax.f32 %v520_v0, %v601_v5  ;;  %v1394_v19 = vadd.s32 %v1252_v8, %v420_v31 }
  0xb3   : >> { %vm470_vm11 = vcmp.lt.s32.totalorder %v1296_v32, 1003  ;;  %vm472_vm12 = vcmp.lt.s32.totalorder %v1330_v50, 1003  ;;  %v524_v21 = vsel %vm480_vm7, %v361_v1, -inf  ;;  %v1403_v25 = vadd.s32 %v1252_v8, %v421_v34  ;;  %v356_v1 = vld [vmem:[%s1263_s29 + $0x90] sm:$0xff] }
  0xb4   : >> { %v1406_v26 = vadd.s32 %v1252_v8, %v422_v35  ;;  %vm482_vm13 = vcmp.lt.s32.totalorder %v1371_v3, 1003  ;;  %v603_v27 = vmax.f32 %v522_v4, %v602_v15  ;;  %v1411_v30 = vadd.s32 %v1252_v8, %v423_v37  ;;  %v350_v35 = vld [vmem:[%s1263_s29 + $0x60] sm:$0xff] }
  0xb5   : >> { %v501_v31 = vsel %vm469_vm8, %v338_v10, -inf  ;;  %v505_v33 = vsel %vm471_vm9, %v342_v13, -inf  ;;  %v526_v34 = vsel %vm481_vm10, %v363_v14, -inf  ;;  %vm483_vm14 = vcmp.lt.s32.totalorder %v1375_v6, 1003  ;;  %v358_v10 = vld [vmem:[%s1263_s29 + $0xa0] sm:$0xff]  ;;  %v371_v13 = vld [vmem:[%s1263_s29 + $0x108] sm:$0xff] }
  0xb6   : >> { %v503_v40 = vsel %vm470_vm11, %v340_v17, -inf  ;;  %v507_v37 = vsel %vm472_vm12, %v344_v18, -inf  ;;  %v604_v41 = vmax.f32 %v524_v21, %v603_v27  ;;  %v1428_v44 = vadd.s32 %v1252_v8, %v424_v45 }
  0xb7   : >> { %v1431_v48 = vadd.s32 %v1252_v8, %v425_v46  ;;  %v509_v49 = vsel %vm473_vm0, %v346_v22, -inf  ;;  %v528_v52 = vsel %vm482_vm13, %v365_v23, -inf  ;;  %vm484_vm15 = vcmp.lt.s32.totalorder %v1378_v7, 1003  ;;  %v362_v22 = vld [vmem:[%s1263_s29 + $0xc0] sm:$0xff]  ;;  %v373_v23 = vld [vmem:[%s1263_s29 + $0x118] sm:$0xff] }
  0xb8   : >> { %v511_v60 = vsel %vm474_vm1, %v348_v29, -inf  ;;  %v605_v45 = vmax.f32 %v526_v34, %v604_v41  ;;  %v565_v0 = vmax.f32 %v501_v31, %v505_v33  ;;  %v1445_v46 = vadd.s32 %v1252_v8, %v1324_v47  ;;  %v360_v47 = vld [vmem:[%s1263_s29 + $0xb0] sm:$0xff] }
  0xb9   : >> { %v513_v11 = vsel %vm475_vm2, %v350_v35, -inf  ;;  %v530_v5 = vsel %vm483_vm14, %v367_v39, -inf  ;;  %v566_v4 = vmax.f32 %v503_v40, %v507_v37  ;;  %vm485_vm0 = vcmp.lt.s32.totalorder %v1381_v9, 1003  ;;  %v366_v35 = vld [vmem:[%s1263_s29 + $0xe0] sm:$0xff]  ;;  %v375_v39 = vld [vmem:[%s1263_s29 + $0x128] sm:$0xff] }
  0xba   : >> { %v515_v12 = vsel %vm476_vm3, %v352_v43, -inf  ;;  %v606_v14 = vmax.f32 %v528_v52, %v605_v45  ;;  %v567_v15 = vmax.f32 %v565_v0, %v509_v49  ;;  %v1459_v16 = vadd.s32 %v1252_v8, %v1337_v53  ;;  %v364_v53 = vld [vmem:[%s1263_s29 + $0xd0] sm:$0xff]  ;;  %v370_v52 = vld [vmem:[%s1263_s29 + $0x100] sm:$0xff] }
  0xbb   : >> { %v517_v17 = vsel %vm477_vm4, %v354_v56, -inf  ;;  %v532_v18 = vsel %vm484_vm15, %v369_v57, -inf  ;;  %v568_v21 = vmax.f32 %v566_v4, %v511_v60  ;;  %vm486_vm1 = vcmp.lt.s32.totalorder %v1394_v19, 1003  ;;  %v377_v56 = vld [vmem:[%s1263_s29 + $0x138] sm:$0xff] }
  0xbc   : >> { %v519_v20 = vsel %vm478_vm5, %v356_v1, -inf  ;;  %v607_v27 = vmax.f32 %v530_v5, %v606_v14  ;;  %v569_v29 = vmax.f32 %v567_v15, %v513_v11  ;;  %v1473_v28 = vadd.s32 %v1252_v8, %v1340_v54  ;;  %v368_v54 = vld [vmem:[%s1263_s29 + $0xf0] sm:$0xff]  ;;  %v374_v11 = vld [vmem:[%s1263_s29 + $0x120] sm:$0xff]  ;;  %v379_v5 = vld [vmem:[%s1263_s29 + $0x148] sm:$0xff] }
  0xbd   : >> { %v521_v31 = vsel %vm479_vm6, %v358_v10, -inf  ;;  %v534_v33 = vsel %vm485_vm0, %v371_v13, -inf  ;;  %v570_v34 = vmax.f32 %v568_v21, %v515_v12  ;;  %vm487_vm2 = vcmp.lt.s32.totalorder %v1403_v25, 1003  ;;  %v378_v15 = vld [vmem:[%s1263_s29 + $0x140] sm:$0xff] }
  0xbe   : >> { %v523_v36 = vsel %vm480_vm7, %v360_v47, -inf  ;;  %v608_v40 = vmax.f32 %v532_v18, %v607_v27  ;;  %v571_v37 = vmax.f32 %v569_v29, %v517_v17  ;;  %v1487_v42 = vadd.s32 %v1252_v8, %v1343_v55  ;;  %v372_v55 = vld [vmem:[%s1263_s29 + $0x110] sm:$0xff]  ;;  %v381_v47 = vld [vmem:[%s1263_s29 + $0x158] sm:$0xff]  ;;  %v383_v27 = vld [vmem:[%s1263_s29 + $0x168] sm:$0xff] }
  0xbf   : >> { %v525_v41 = vsel %vm481_vm10, %v362_v22, -inf  ;;  %v536_v43 = vsel %vm486_vm1, %v373_v23, -inf  ;;  %v572_v49 = vmax.f32 %v570_v34, %v519_v20  ;;  %vm488_vm3 = vcmp.lt.s32.totalorder %v1406_v26, 1003  ;;  %v382_v20 = vld [vmem:[%s1263_s29 + $0x160] sm:$0xff] }
  0xc0   : >> { %v527_v51 = vsel %vm482_vm13, %v364_v53, -inf  ;;  %v609_v57 = vmax.f32 %v534_v33, %v608_v40  ;;  %v573_v60 = vmax.f32 %v571_v37, %v521_v31  ;;  %v1501_v59 = vadd.s32 %v1252_v8, %v1349_v58  ;;  %v376_v58 = vld [vmem:[%s1263_s29 + $0x130] sm:$0xff] }
  0xc1   : >> { %v529_v45 = vsel %vm483_vm14, %v366_v35, -inf  ;;  %v538_v0 = vsel %vm487_vm2, %v375_v39, -inf  ;;  %v574_v1 = vmax.f32 %v572_v49, %v523_v36  ;;  %vm489_vm4 = vcmp.lt.s32.totalorder %v1411_v30, 1003  ;;  %v385_v35 = vld [vmem:[%s1263_s29 + $0x178] sm:$0xff]  ;;  %v386_v39 = vld [vmem:[%s1263_s29 + $0x180] sm:$0xff] }
  0xc2   : >> { %v531_v3 = vsel %vm484_vm15, %v368_v54, -inf  ;;  %v610_v4 = vmax.f32 %v536_v43, %v609_v57  ;;  %v575_v10 = vmax.f32 %v573_v60, %v525_v41  ;;  %v1515_v6 = vadd.s32 %v1252_v8, %v1356_v61  ;;  %v380_v61 = vld [vmem:[%s1263_s29 + $0x150] sm:$0xff]  ;;  %v387_v43 = vld [vmem:[%s1263_s29 + $0x188] sm:$0xff]  ;;  %v390_v49 = vld [vmem:[%s1263_s29 + $0x1a0] sm:$0xff] }
  0xc3   : >> { %v533_v13 = vsel %vm485_vm0, %v370_v52, -inf  ;;  %v540_v12 = vsel %vm488_vm3, %v377_v56, -inf  ;;  %v576_v14 = vmax.f32 %v574_v1, %v527_v51  ;;  %vm490_vm5 = vcmp.lt.s32.totalorder %v1428_v44, 1003  ;;  %v389_v57 = vld [vmem:[%s1263_s29 + $0x198] sm:$0xff]  ;;  %v394_v60 = vld [vmem:[%s1263_s29 + $0x1c0] sm:$0xff]  ;;  %v396_v1 = vld [vmem:[%s1263_s29 + $0x1d0] sm:$0xff] }
  0xc4   : >> { %v535_v7 = vsel %vm486_vm1, %v372_v55, -inf  ;;  %v611_v17 = vmax.f32 %v538_v0, %v610_v4  ;;  %v577_v18 = vmax.f32 %v575_v10, %v529_v45  ;;  %v1529_v9 = vadd.s32 %v1252_v8, %v1359_v62  ;;  %v384_v62 = vld [vmem:[%s1263_s29 + $0x170] sm:$0xff]  ;;  %v398_v4 = vld [vmem:[%s1263_s29 + $0x1e0] sm:$0xff] }
  0xc5   : >> { %v537_v21 = vsel %vm487_vm2, %v374_v11, -inf  ;;  %v542_v22 = vsel %vm489_vm4, %v379_v5, -inf  ;;  %v578_v23 = vmax.f32 %v576_v14, %v531_v3  ;;  %vm491_vm6 = vcmp.lt.s32.totalorder %v1431_v48, 1003  ;;  %v391_v3 = vld [vmem:[%s1263_s29 + $0x1a8] sm:$0xff] }
  0xc6   : >> { %v539_v19 = vsel %vm488_vm3, %v376_v58, -inf  ;;  %v612_v29 = vmax.f32 %v540_v12, %v611_v17  ;;  %v579_v53 = vmax.f32 %v577_v18, %v533_v13  ;;  %v1543_v25 = vadd.s32 %v1252_v8, %v1362_v63  ;;  %v388_v63 = vld [vmem:[%s1263_s29 + $0x190] sm:$0xff] }
  0xc7   : >> { %v541_v31 = vsel %vm489_vm4, %v378_v15, -inf  ;;  %v544_v33 = vsel %vm490_vm5, %v381_v47, -inf  ;;  %v580_v34 = vmax.f32 %v578_v23, %v535_v7  ;;  %vm492_vm7 = vcmp.lt.s32.totalorder %v1445_v46, 1003  ;;  %v400_v12 = vld [vmem:[%s1263_s29 + $0x1f0] sm:$0xff]  ;;  %v393_v47 = vld [vmem:[%s1263_s29 + $0x1b8] sm:$0xff] }
  0xc8   : >> { %v613_v26 = vmax.f32 %v542_v22, %v612_v29  ;;  %v543_v36 = vsel %vm490_vm5, %v380_v61, -inf  ;;  %v581_v40 = vmax.f32 %v579_v53, %v537_v21  ;;  %v1557_v30 = vadd.s32 %v1252_v8, %v1368_v2  ;;  %v392_v8 = vld [vmem:[%s1263_s29 + $0x1b0] sm:$0xff]  ;;  %v395_v22 = vld [vmem:[%s1263_s29 + $0x1c8] sm:$0xff]  ;;  %v397_v29 = vld [vmem:[%s1263_s29 + $0x1d8] sm:$0xff] }
  0xc9   : >> { %v545_v37 = vsel %vm491_vm6, %v382_v20, -inf  ;;  %v546_v54 = vsel %vm491_vm6, %v383_v27, -inf  ;;  %v582_v41 = vmax.f32 %v580_v34, %v539_v19  ;;  %vm493_vm10 = vcmp.lt.s32.totalorder %v1459_v16, 1003  ;;  %v627_v34 = vld [vmem:[#allocation2] sm:$0xff] }
  0xca   : >> { %v614_v44 = vmax.f32 %v544_v33, %v613_v26  ;;  %v547_v52 = vsel %vm492_vm7, %v384_v62, -inf  ;;  %v583_v56 = vmax.f32 %v581_v40, %v541_v31  ;;  %vm494_vm13 = vcmp.lt.s32.totalorder %v1473_v28, 1003  ;;  %v399_v26 = vld [vmem:[%s1263_s29 + $0x1e8] sm:$0xff] }
  0xcb   : >> { %v548_v2 = vsel %vm492_vm7, %v385_v35, -inf  ;;  %v549_v48 = vsel %vm493_vm10, %v386_v39, -inf  ;;  %v584_v51 = vmax.f32 %v582_v41, %v543_v36  ;;  %vm495_vm14 = vcmp.lt.s32.totalorder %v1487_v42, 1003  ;;  %v339_v35 = vld [vmem:[%s1263_s29 + $0x8] sm:$0xff] }
  0xcc   : >> { %v615_v55 = vmax.f32 %v546_v54, %v614_v44  ;;  %v551_v45 = vsel %vm494_vm13, %v388_v63, -inf  ;;  %v585_v0 = vmax.f32 %v583_v56, %v545_v37  ;;  %vm496_vm15 = vcmp.lt.s32.totalorder %v1501_v59, 1003  ;;  %v343_v39 = vld [vmem:[%s1263_s29 + $0x28] sm:$0xff]  ;;  %v341_v63 = vld [vmem:[%s1263_s29 + $0x18] sm:$0xff] }
  0xcd   : >> { %v550_v46 = vsel %vm493_vm10, %v387_v43, -inf  ;;  %v553_v11 = vsel %vm495_vm14, %v390_v49, -inf  ;;  %v586_v5 = vmax.f32 %v584_v51, %v547_v52  ;;  %vm497_vm0 = vcmp.lt.s32.totalorder %v1515_v6, 1003  ;;  %v345_v37 = vld [vmem:[%s1263_s29 + $0x38] sm:$0xff] }
  0xce   : >> { %v616_v10 = vmax.f32 %v548_v2, %v615_v55  ;;  %v555_v58 = vsel %vm496_vm15, %v392_v8, -inf  ;;  %v587_v13 = vmax.f32 %v585_v0, %v549_v48  ;;  %vm498_vm1 = vcmp.lt.s32.totalorder %v1529_v9, 1003  ;;  %v401_v54 = vld [vmem:[%s1263_s29 + $0x1f8] sm:$0xff] }
  0xcf   : >> { %v552_v16 = vsel %vm494_vm13, %v389_v57, -inf  ;;  %v557_v14 = vsel %vm497_vm0, %v394_v60, -inf  ;;  %v588_v15 = vmax.f32 %v586_v5, %v551_v45  ;;  %vm499_vm2 = vcmp.lt.s32.totalorder %v1543_v25, 1003  ;;  %v628_v57 = vld [vmem:[#allocation2 + $0x8] sm:$0xff] }
  0xd0   : >> { %v617_v7 = vmax.f32 %v550_v46, %v616_v10  ;;  %v559_v17 = vsel %vm498_vm1, %v396_v1, -inf  ;;  %v589_v18 = vmax.f32 %v587_v13, %v553_v11  ;;  %vm500_vm3 = vcmp.lt.s32.totalorder %v1557_v30, 1003 }
  0xd1   : >> { %v554_v28 = vsel %vm495_vm14, %v391_v3, -inf  ;;  %v561_v61 = vsel %vm499_vm2, %v398_v4, -inf  ;;  %v590_v21 = vmax.f32 %v588_v15, %v555_v58  ;;  %v563_v20 = vsel %vm500_vm3, %v400_v12, -inf }
  0xd2   : >> { %v618_v23 = vmax.f32 %v552_v16, %v617_v7  ;;  %v591_v27 = vmax.f32 %v589_v18, %v557_v14  ;;  %v556_v19 = vsel %vm496_vm15, %v393_v47, -inf  ;;  %v558_v31 = vsel %vm497_vm0, %v395_v22, -inf }
  0xd3   : >> { %v592_v42 = vmax.f32 %v590_v21, %v559_v17  ;;  %v560_v40 = vsel %vm498_vm1, %v397_v29, -inf  ;;  %v502_v43 = vsel %vm469_vm8, %v339_v35, -inf  ;;  %v506_v6 = vsel %vm471_vm9, %v343_v39, -inf }
  0xd4   : >> { %v619_v53 = vmax.f32 %v554_v28, %v618_v23  ;;  %v593_v62 = vmax.f32 %v591_v27, %v561_v61  ;;  %v562_v49 = vsel %vm499_vm2, %v399_v26, -inf  ;;  %v504_v9 = vsel %vm470_vm11, %v341_v63, -inf }
  0xd5   : >> { %v594_v33 = vmax.f32 %v592_v42, %v563_v20  ;;  %v508_v56 = vsel %vm472_vm12, %v345_v37, -inf  ;;  %v564_v8 = vsel %vm500_vm3, %v401_v54, -inf  ;;  %v596_v2 = vmax.f32 %v502_v43, %v506_v6 }
  0xd6   : >> { %v620_v36 = vmax.f32 %v556_v19, %v619_v53  ;;  %v597_v38 = vmax.f32 %v504_v9, %v508_v56 }
  0xd7   : >> { %v595_v59 = vmax.f32 %v593_v62, %v594_v33 }
  0xd8   : >> { %v621_v41 = vmax.f32 %v558_v31, %v620_v36 }
  0xd9   : >> { %v629_v44 = vmax.f32 %v627_v34, %v595_v59 }
  0xda   : >> { %v622_v52 = vmax.f32 %v560_v40, %v621_v41 }
  0xdb   : >> { %631 = vst [vmem:[#allocation2] sm:$0xff] %v629_v44 }
  0xdc   : >> { %v623_v24 = vmax.f32 %v562_v49, %v622_v52 }
  0xde   : >> { %v624_v48 = vmax.f32 %v564_v8, %v623_v24 }
  0xe0   : >> { %v625_v51 = vmax.f32 %v596_v2, %v624_v48  ;;  %330 = sbr.rel (!%p328_p0) target bundleno = 157 (0x9d), region = 112 }
  0xe2   : >> { %v626_v25 = vmax.f32 %v597_v38, %v625_v51 }
  0xe4   : >> { %v630_v60 = vmax.f32 %v628_v57, %v626_v25 }
  0xe6   : >> { %632 = vst [vmem:[#allocation2 + $0x8] sm:$0xff] %v630_v60 }
  0xe7 PF: > { %v636_v32 = vld [vmem:[#allocation2] sm:$0xff]  ;;  %v1025_v1 = vmov 1966171168   ;;  %v656_v11 = vlaneseq  ;;  %s816_s2 = sshll.u32 %s1003_s9, 5  ;;  %s688_s5 = sshll.u32 %s1159_s4, 4  ;;  %s1643_s5 = int_to_ptr.vmem [resolvable:$true] %s688_s5 }
  0xe8   : > { %v638_v30 = vrot.slane %v636_v32, 4  ;;  %v654_v46 = vunpack.c.l.s4 %v1025_v1  ;;  %s1641_s27 = scalar_lea.hbm %s1692_s1, %s816_s2  ;;  %s674_s3 = scalar_lea.sflag [#allocation5], %s1143_s30 }
  0xe9   : > { %v657_v13 = vshrl.u32 %v656_v11, 7  ;;  %vm670_vm8 = vcmp.lt.s32.totalorder %v656_v11, 256  ;;  %s921_s13 = scalar_lea.vmem %s1643_s5, 32  ;;  %s1026_s9 = smov [#allocation6]  }
  0xea   : > { %v639_v45 = vmax.f32 %v636_v32, %v638_v30  ;;  %v655_v58 = vunpack.c.0.s8 %v654_v46  ;;  %p922_p13 = scmp.ne.s32.totalorder %s1643_s5, %s921_s13  ;;  %s925_s17 = sshll.u32 %s1026_s9, 4  ;;  %s926_s17 = int_to_ptr.vmem [resolvable:$false] %s925_s17 }
  0xeb   : > { %s927_s15 = scalar_lea.vmem %s926_s17, 64  ;;  %p928_p4 = scmp.lt.s32.totalorder %s1643_s5, %s926_s17 }
  0xec   : > { %v640_v5 = vrot.slane %v639_v45, 2  ;;  %v658_v47 = vsub.s32 %v655_v58, %v657_v13  ;;  %p923_p1 = pnand %p922_p13, %p1084_p9  ;;  %p929_p5 = scmp.lt.s32.totalorder %s927_s15, %s921_s13 }
  0xed   : > { %v637_v50 = vld [vmem:[#allocation2 + $0x8] sm:$0xff] }
  0xee   : > { %v644_v55 = vrot.slane %v637_v50, 4  ;;  %v641_v4 = vmax.f32 %v639_v45, %v640_v5  ;;  %p924_p2 = pneg %p923_p1  ;;  %p930_p6 = por %p929_p5, %p928_p4 }
  0xf0   : > { %v645_v0 = vmax.f32 %v637_v50, %v644_v55  ;;  %v642_v12 = vrot.slane %v641_v4, 1  ;;  %p931_p3 = pnand %p930_p6, %p924_p2 }
  0xf2   : > { %v646_v3 = vrot.slane %v645_v0, 2  ;;  %v643_v14 = vmax.f32 %v641_v4, %v642_v12 }
  0xf4   : > { %v647_v10 = vmax.f32 %v645_v0, %v646_v3 }
  0xf6   : > { %v648_v16 = vrot.slane %v647_v10, 1 }
  0xf8   : > { %v649_v15 = vmax.f32 %v647_v10, %v648_v16 }
  0xfa   : > { %v652_v7 = vcombine.low %v643_v14, %v649_v15 }
  0xfc   : > { %v659_v17 = vrot.slane %v652_v7, %v658_v47 }
  0xfe   : > { %v666_v18 = vrot.slane %v659_v17, %v658_v47 }
 0x100   : > { %672 = vst.msk [vmem:[%s1159_s4] sm:$0x3] %vm670_vm8, %v666_v18 }
 0x101   : > { %934 = shalt.err (!%p931_p3)
}
 0x102   : > { %s935_s30 = scalar_lea.hbm %s1641_s27, 32  ;;  %s939_s21 = scalar_lea.hbm %s1692_s1, 64 }
 0x103   : > { %p936_p7 = scmp.ne.s32.totalorder %s1641_s27, %s935_s30  ;;  %p940_p8 = scmp.lt.u32.totalorder %s1641_s27, %s1692_s1 }
 0x104   : > { %p941_p12 = scmp.lt.u32.totalorder %s939_s21, %s935_s30  ;;  %p943_p13 = scmp.lt.u32.totalorder %s935_s30, %s1641_s27 }
 0x105   : > { %p937_p10 = pnand %p936_p7, %p1084_p9 }
 0x106   : > { %p942_p0 = por %p941_p12, %p940_p8 }
 0x107   : > { %p938_p11 = pneg %p937_p10 }
 0x108   : > { %p944_p1 = por %p943_p13, %p942_p0 }
 0x10a   : > { %p945_p2 = pnand %p944_p1, %p938_p11 }
 0x10c   : > { %948 = shalt.err (!%p945_p2)
}
 0x10d   : > { %818 = dma.vmem_to_hbm [thread:$0]  (%p1084_p9), %s1643_s5, 32, %s1641_s27, %s674_s3  }
 0x10e PF: > { %s700_s24 = sand.u32 1, %s991_s6   ;;  %p1697_p4 = scmp.ne.s32.totalorder %s1696_s20, 0 }
 0x10f   : > { %p1698_p5 = scmp.ge.s32.totalorder %s1011_s11, 2  ;;  %s701_s26 = scalar_lea.sflag [#allocation5], %s700_s24 }
 0x111   : > { %p821_p6 = pnand %p1698_p5, %p1697_p4 }
 0x113   : > { %986 = dma.done.wait (!%p821_p6), %s701_s26, 32  }
 0x114   : > { %988 = vsyncadd (!%p821_p6), %s701_s26, 4294967264  ;;  %s17_s11 = sadd.s32 1, %s1011_s11   ;;  %s1699_s6 = smov %s995_s7 }
 0x115   : > { %p14_p3 = scmp.ge.s32.totalorder %s17_s11, 4   ;;  %s1700_s7 = smov %s999_s8 }
 0x116   : > { %s1701_s8 = smov %s1089_s19  ;;  %s1702_s9 = smov %s1007_s10 }
 0x117   : > { %s1703_s10 = smov %s1705_s14  ;;  %16 = sbr.rel (!%p14_p3) target bundleno = 6 (0x6), region = 123 }
 0x11e   :  { %706 = vsyncpa [#allocation4], 1 }
 0x11f   :  { %708 = vsyncpa [#allocation4 + $0x1], 1 }
 0x120   :  { %709 = vsyncpa [#allocation5], 1 }
 0x121   :  { %711 = vsyncpa [#allocation5 + $0x1], 1 }

</bundles_post_ra>
